<compile_context>
chip_gen: v7x
topology: tpu7x:2x2x1
jax: 0.10.0
libtpu: 0.0.40
codegen_flags: <defaults>
</compile_context>

<pallas_src>
import functools

import jax
import jax.numpy as jnp
from jax.experimental import pallas as pl
from jax.experimental.pallas import tpu as pltpu


def _round_up(x, m):
    return ((x + m - 1) // m) * m


def value_net_kernel(x_ref, w1_ref, b1_ref, w2_ref, b2_ref, w3_ref, b3_ref,
                     out_ref):
    # x_ref: (S, TB) f32, batch on the lane axis.
    x = x_ref[...].astype(jnp.bfloat16)

    # fc1 + ReLU: (H, S) @ (S, TB) -> (H, TB); bf16 MXU operands, f32 acc.
    h1 = jnp.dot(w1_ref[...], x, preferred_element_type=jnp.float32)
    h1 = jnp.maximum(h1 + b1_ref[...], 0.0)

    # fc2 + ReLU: (H2, H) @ (H, TB) -> (H2, TB)
    h2 = jnp.dot(w2_ref[...], h1.astype(jnp.bfloat16),
                 preferred_element_type=jnp.float32)
    h2 = jnp.maximum(h2 + b2_ref[...], 0.0)

    # fc3: out_features == 1 -> VPU multiply + sublane (XLU) reduce instead of
    # an MXU matmul with a single useful output lane.
    v = jnp.sum(h2 * w3_ref[...], axis=0, keepdims=True) + b3_ref[...]

    out_ref[...] = v.astype(out_ref.dtype)   # (1, TB) lane-dense store


@functools.partial(jax.jit, static_argnames=("batch_tile",))
def value_net_forward(x, params, *, batch_tile=256):
    """x: (B, state_dim) f32. params: torch-layout (out, in) weights."""
    w1, b1 = params["w1"], params["b1"]
    w2, b2 = params["w2"], params["b2"]
    w3, b3 = params["w3"], params["b3"]

    B, S = x.shape
    H = w1.shape[0]
    H2 = w2.shape[0]

    # Batch tile: multiple of 128 so the x tile and the (1, TB) output block
    # are lane-aligned.  Resident weights + 2x(x tile + out tile) stay far
    # under the 32 MiB scoped-VMEM default, even on v7x, at these sizes.
    tb = min(_round_up(batch_tile, 128), _round_up(B, 128))
    b_pad = _round_up(B, tb)
    grid = (b_pad // tb,)

    # Zero-pad the batch and put it on the lane axis (fused under jit).
    x_t = jnp.pad(x, ((0, b_pad - B), (0, 0))).T    # (S, b_pad)

    resident = lambda shape: pl.BlockSpec(shape, lambda i: (0,) * len(shape))

    flops = 2 * b_pad * (S * H + H * H2 + H2)
    bytes_accessed = (x_t.size * 4 + b_pad * 4
                      + w1.size * 2 + w2.size * 2
                      + (b1.size + b2.size + w3.size + b3.size) * 4)

    out = pl.pallas_call(
        value_net_kernel,
        out_shape=jax.ShapeDtypeStruct((1, b_pad), jnp.float32),
        grid=grid,
        in_specs=[
            pl.BlockSpec((S, tb), lambda i: (0, i)),   # x: pipelined batch tile
            resident(w1.shape), resident(b1.shape),    # weights VMEM-resident
            resident(w2.shape), resident(b2.shape),
            resident(w3.shape), resident(b3.shape),
        ],
        out_specs=pl.BlockSpec((1, tb), lambda i: (0, i)),
        compiler_params=pltpu.CompilerParams(
            dimension_semantics=("parallel",)),
        cost_estimate=pl.CostEstimate(
            flops=flops, transcendentals=0, bytes_accessed=bytes_accessed),
    )(x_t, w1, b1, w2, b2, w3, b3)

    return out[0, :B].reshape(B, 1)


def init_params(key, state_dim, hidden_dim):
    """Deterministic synthetic init (uniform, torch-Linear-like fan-in bound).

    Weights in torch layout (out_features, in_features); the two MXU weight
    matrices are kept in bf16, biases and the fc3 column stay f32."""
    h2 = hidden_dim // 2
    keys = jax.random.split(key, 6)

    def unif(k, shape, fan_in):
        bound = 1.0 / jnp.sqrt(float(fan_in))
        return jax.random.uniform(k, shape, jnp.float32, -bound, bound)

    return {
        "w1": unif(keys[0], (hidden_dim, state_dim), state_dim).astype(jnp.bfloat16),
        "b1": unif(keys[1], (hidden_dim, 1), state_dim),
        "w2": unif(keys[2], (h2, hidden_dim), hidden_dim).astype(jnp.bfloat16),
        "b2": unif(keys[3], (h2, 1), hidden_dim),
        "w3": unif(keys[4], (h2, 1), h2),     # used on the VPU -> f32
        "b3": unif(keys[5], (1, 1), h2),
    }


def value_net_reference(x, params):
    """Pure-JAX reference with the same dtype policy as the kernel."""
    xt = x.T.astype(jnp.bfloat16)                                   # (S, B)
    h1 = jnp.maximum(
        jnp.dot(params["w1"], xt, preferred_element_type=jnp.float32)
        + params["b1"], 0.0)                                        # (H, B)
    h2 = jnp.maximum(
        jnp.dot(params["w2"], h1.astype(jnp.bfloat16),
                preferred_element_type=jnp.float32)
        + params["b2"], 0.0)                                        # (H2, B)
    v = jnp.sum(h2 * params["w3"], axis=0, keepdims=True) + params["b3"]
    return v.T                                                      # (B, 1)


if __name__ == "__main__":
    key = jax.random.PRNGKey(0)
    k_x, k_p = jax.random.split(key)

    batch = 8
    state_dim = 8
    hidden_dim = 32

    x = jax.random.normal(k_x, (batch, state_dim), jnp.float32)
    params = init_params(k_p, state_dim, hidden_dim)

    out = jax.block_until_ready(value_net_forward(x, params))
    ref = value_net_reference(x, params)

    assert out.shape == (batch, 1), out.shape
    assert jnp.allclose(out, ref, atol=1e-4, rtol=1e-4), (out, ref)

    print("KERNEL_OK")
</pallas_src>

<mosaic_0001>
module attributes {stable_mosaic.version = 11 : i64} {
  func.func @value_net_kernel(%arg0: i32, %arg1: memref<8x128xf32, #tpu.memory_space<vmem>>, %arg2: memref<32x8xbf16, #tpu.memory_space<vmem>>, %arg3: memref<32x1xf32, #tpu.memory_space<vmem>>, %arg4: memref<16x32xbf16, #tpu.memory_space<vmem>>, %arg5: memref<16x1xf32, #tpu.memory_space<vmem>>, %arg6: memref<16x1xf32, #tpu.memory_space<vmem>>, %arg7: memref<1x1xf32, #tpu.memory_space<vmem>>, %arg8: memref<1x128xf32, #tpu.memory_space<vmem>>) attributes {dimension_semantics = [#tpu.dimension_semantics<parallel>], iteration_bounds = array<i64: 1>, scalar_prefetch = 0 : i64, scratch_operands = 0 : i64, tpu.core_type = #tpu.core_type<tc>, window_params = [{transform_indices = @transform_0, window_bounds = array<i64: 8, 128>}, {pipeline_mode = #tpu.pipeline_mode<synchronous>, transform_indices = @transform_1, window_bounds = array<i64: 32, 8>}, {pipeline_mode = #tpu.pipeline_mode<synchronous>, transform_indices = @transform_2, window_bounds = array<i64: 32, 1>}, {pipeline_mode = #tpu.pipeline_mode<synchronous>, transform_indices = @transform_3, window_bounds = array<i64: 16, 32>}, {pipeline_mode = #tpu.pipeline_mode<synchronous>, transform_indices = @transform_4, window_bounds = array<i64: 16, 1>}, {pipeline_mode = #tpu.pipeline_mode<synchronous>, transform_indices = @transform_5, window_bounds = array<i64: 16, 1>}, {pipeline_mode = #tpu.pipeline_mode<synchronous>, transform_indices = @transform_6, window_bounds = array<i64: 1, 1>}, {transform_indices = @transform_7, window_bounds = array<i64: 1, 128>}]} {
    %c0 = arith.constant 0 : index
    %c0_0 = arith.constant 0 : index
    %0 = vector.load %arg1[%c0, %c0_0] : memref<8x128xf32, #tpu.memory_space<vmem>>, vector<8x128xf32>
    %1 = arith.truncf %0 : vector<8x128xf32> to vector<8x128xbf16>
    %c0_1 = arith.constant 0 : index
    %c0_2 = arith.constant 0 : index
    %2 = vector.load %arg2[%c0_1, %c0_2] : memref<32x8xbf16, #tpu.memory_space<vmem>>, vector<32x8xbf16>
    %cst = arith.constant dense<0.000000e+00> : vector<32x128xf32>
    %3 = tpu.matmul %2, %1, %cst {dimension_numbers = #tpu.dot_dimension_numbers<[1], [0], [0], [1], [0, 0, 1, 1], [], []>} : vector<32x8xbf16>, vector<8x128xbf16>, vector<32x128xf32> -> vector<32x128xf32>
    %c0_3 = arith.constant 0 : index
    %c0_4 = arith.constant 0 : index
    %4 = vector.load %arg3[%c0_3, %c0_4] : memref<32x1xf32, #tpu.memory_space<vmem>>, vector<32x1xf32>
    %5 = vector.broadcast %4 : vector<32x1xf32> to vector<32x128xf32>
    %6 = arith.addf %3, %5 : vector<32x128xf32>
    %cst_5 = arith.constant 0.000000e+00 : f32
    %7 = vector.broadcast %cst_5 : f32 to vector<32x128xf32>
    %8 = arith.maximumf %6, %7 : vector<32x128xf32>
    %c0_6 = arith.constant 0 : index
    %c0_7 = arith.constant 0 : index
    %9 = vector.load %arg4[%c0_6, %c0_7] : memref<16x32xbf16, #tpu.memory_space<vmem>>, vector<16x32xbf16>
    %10 = arith.truncf %8 : vector<32x128xf32> to vector<32x128xbf16>
    %cst_8 = arith.constant dense<0.000000e+00> : vector<16x128xf32>
    %11 = tpu.matmul %9, %10, %cst_8 {dimension_numbers = #tpu.dot_dimension_numbers<[1], [0], [0], [1], [0, 0, 1, 1], [], []>} : vector<16x32xbf16>, vector<32x128xbf16>, vector<16x128xf32> -> vector<16x128xf32>
    %c0_9 = arith.constant 0 : index
    %c0_10 = arith.constant 0 : index
    %12 = vector.load %arg5[%c0_9, %c0_10] : memref<16x1xf32, #tpu.memory_space<vmem>>, vector<16x1xf32>
    %13 = vector.broadcast %12 : vector<16x1xf32> to vector<16x128xf32>
    %14 = arith.addf %11, %13 : vector<16x128xf32>
    %cst_11 = arith.constant 0.000000e+00 : f32
    %15 = vector.broadcast %cst_11 : f32 to vector<16x128xf32>
    %16 = arith.maximumf %14, %15 : vector<16x128xf32>
    %c0_12 = arith.constant 0 : index
    %c0_13 = arith.constant 0 : index
    %17 = vector.load %arg6[%c0_12, %c0_13] : memref<16x1xf32, #tpu.memory_space<vmem>>, vector<16x1xf32>
    %18 = vector.broadcast %17 : vector<16x1xf32> to vector<16x128xf32>
    %19 = arith.mulf %16, %18 : vector<16x128xf32>
    %cst_14 = arith.constant dense<0.000000e+00> : vector<128xf32>
    %20 = vector.multi_reduction <add>, %19, %cst_14 [0] : vector<16x128xf32> to vector<128xf32>
    %21 = vector.shape_cast %20 : vector<128xf32> to vector<1x128xf32>
    %c0_15 = arith.constant 0 : index
    %c0_16 = arith.constant 0 : index
    %22 = vector.load %arg7[%c0_15, %c0_16] : memref<1x1xf32, #tpu.memory_space<vmem>>, vector<1x1xf32>
    %23 = vector.broadcast %22 : vector<1x1xf32> to vector<1x128xf32>
    %24 = arith.addf %21, %23 : vector<1x128xf32>
    %c0_17 = arith.constant 0 : index
    %c0_18 = arith.constant 0 : index
    %25 = vector.load %arg8[%c0_17, %c0_18] : memref<1x128xf32, #tpu.memory_space<vmem>>, vector<1x128xf32>
    tpu.vector_store %arg8[%c0_17, %c0_18], %24 {strides = array<i32>} : memref<1x128xf32, #tpu.memory_space<vmem>>, vector<1x128xf32>,
    return
  }
  func.func @transform_0(%arg0: i32) -> (i32, i32) {
    %c0_i32 = arith.constant 0 : i32
    %c0_i32_0 = arith.constant 0 : i32
    return %c0_i32, %arg0 : i32, i32
  }
  func.func @transform_1(%arg0: i32) -> (i32, i32) {
    %c0_i32 = arith.constant 0 : i32
    %c0_i32_0 = arith.constant 0 : i32
    %c0_i32_1 = arith.constant 0 : i32
    return %c0_i32, %c0_i32_0 : i32, i32
  }
  func.func @transform_2(%arg0: i32) -> (i32, i32) {
    %c0_i32 = arith.constant 0 : i32
    %c0_i32_0 = arith.constant 0 : i32
    %c0_i32_1 = arith.constant 0 : i32
    return %c0_i32, %c0_i32_0 : i32, i32
  }
  func.func @transform_3(%arg0: i32) -> (i32, i32) {
    %c0_i32 = arith.constant 0 : i32
    %c0_i32_0 = arith.constant 0 : i32
    %c0_i32_1 = arith.constant 0 : i32
    return %c0_i32, %c0_i32_0 : i32, i32
  }
  func.func @transform_4(%arg0: i32) -> (i32, i32) {
    %c0_i32 = arith.constant 0 : i32
    %c0_i32_0 = arith.constant 0 : i32
    %c0_i32_1 = arith.constant 0 : i32
    return %c0_i32, %c0_i32_0 : i32, i32
  }
  func.func @transform_5(%arg0: i32) -> (i32, i32) {
    %c0_i32 = arith.constant 0 : i32
    %c0_i32_0 = arith.constant 0 : i32
    %c0_i32_1 = arith.constant 0 : i32
    return %c0_i32, %c0_i32_0 : i32, i32
  }
  func.func @transform_6(%arg0: i32) -> (i32, i32) {
    %c0_i32 = arith.constant 0 : i32
    %c0_i32_0 = arith.constant 0 : i32
    %c0_i32_1 = arith.constant 0 : i32
    return %c0_i32, %c0_i32_0 : i32, i32
  }
  func.func @transform_7(%arg0: i32) -> (i32, i32) {
    %c0_i32 = arith.constant 0 : i32
    %c0_i32_0 = arith.constant 0 : i32
    return %c0_i32, %arg0 : i32, i32
  }
}

</mosaic_0001>

<bundles_post_ra>
// kernel: value_net_forward.1
= control target key start
LH: loop header
LB: loop body
LE: loop exit
PB: predicated region body
PF: predicated region fallthrough
CT: control target
= control target key end

     0   :  { %vm76_vm0 = vcmask 1043456   ;;  %vm69_vm1 = vcmask 64512   ;;  %v273_v1 = vmov 0   ;;  %v274_v16 = vmov 0.0   ;;  %s360_s0 = inlined_call_operand.vmem [shape: f32[8,128], index: 0, kind: input, shape index: {}]   ;;  %s361_s1 = inlined_call_operand.vmem [shape: bf16[32,8], index: 1, kind: input, shape index: {}]   ;;  %s362_s2 = inlined_call_operand.vmem [shape: f32[32,1], index: 2, kind: input, shape index: {}]   ;;  %s363_s6 = inlined_call_operand.<no memory space> [shape: f32[1,1], index: 6, kind: input, shape index: {}]   ;;  %s364_s4 = inlined_call_operand.vmem [shape: f32[16,1], index: 4, kind: input, shape index: {}]   ;;  %s365_s5 = inlined_call_operand.vmem [shape: f32[16,1], index: 5, kind: input, shape index: {}]   ;;  %s366_s3 = inlined_call_operand.vmem [shape: bf16[16,32], index: 3, kind: input, shape index: {}]   ;;  %s367_s7 = inlined_call_operand.vmem [shape: f32[1,128], index: 7, kind: output, shape index: {}]  }
   0x1   :  { %v29_v0 = vld [vmem:[%s360_s0] sm:$0xff]  ;;  %268 = vset.pattern.permute.xlu0 %v273_v1  ;;  %269 = vset.pattern.permute.xlu1 %v273_v1  ;;  %v12_v2 = vstv %s363_s6  ;;  %v271_v7 = vld [vmem:[%s361_s1 + $0x8] sm:$0xff]   ;;  %v37_v8 = vld [vmem:[%s362_s2 + $0x10] sm:$0xff]  ;;  %vm275_vm2 = vmmov 0   ;;  %vm154_vm3 = vcmask 261120   ;;  %v228_v50 = vlaneseq }
   0x2   :  { %v30_v3 = vpack.c.bf16 %v29_v0, %v29_v0  ;;  %v270_v4 = vld [vmem:[%s361_s1] sm:$0xff]   ;;  %13 = vst [vmem:[#allocation2] sm:$0x1] %v12_v2  ;;  %v36_v9 = vld [vmem:[%s362_s2 + $0x8] sm:$0xff]  ;;  %51 = vperm.xlu1 %269, %v37_v8   ;;  %v38_v10 = vld [vmem:[%s362_s2 + $0x18] sm:$0xff]  ;;  %256 = vmatprep.subr.bf16.mxu1 %v274_v16 }
   0x3   :  { %v35_v5 = vld [vmem:[%s362_s2] sm:$0xff]  ;;  %252 = vmatprep.mubr.msk.bf16.mxu0 %vm69_vm1, %v270_v4  ;;  %v138_v12 = vld [vmem:[%s364_s4 + $0x8] sm:$0xff]  ;;  %260 = vmatprep.mubr.msk.bf16.mxu1 %vm275_vm2, %v274_v16  ;;  %v229_v53 = vshrl.u32 %v228_v50, 7 }
   0x4   :  { %264 = vmatprep.subr.msk.bf16.mxu0 %vm76_vm0, %v30_v3  ;;  %v78_v6 = vsel %vm76_vm0, %v30_v3, 0  ;;  %41 = vperm.xlu0 %268, %v35_v5   ;;  %v137_v11 = vld [vmem:[%s364_s4] sm:$0xff]  ;;  %v202_v14 = vld [vmem:[%s365_s5 + $0x8] sm:$0xff] }
   0x5   :  { %251 = vmatpush3.bf16.msra.mxu0 %v78_v6  ;;  %v201_v13 = vld [vmem:[%s365_s5] sm:$0xff]  ;;  %v230_v56 = vsub.s32 0, %v229_v53 }
   0x6   :  { %56 = vperm.xlu1 %269, %v38_v10   ;;  %v272_v35 = vld [vmem:[%s366_s3] sm:$0xff]  }
   0x8   :  { %253 = vmatmul.mubr.msk.bf16.vlgmr.msra.gmra.mrb[0].mxu0 %vm69_vm1, %v271_v7  ;;  %46 = vperm.xlu0 %268, %v36_v9  }
   0x9   :  { %v222_v15 = vld [vmem:[#allocation2] sm:$0x1] }
   0xa   :  { %146 = vperm.xlu1 %269, %v138_v12  }
   0xc   :  { %141 = vperm.xlu0 %268, %v137_v11  }
   0xe   :  { %210 = vperm.xlu1 %269, %v202_v14  }
  0x10   :  { %205 = vperm.xlu0 %268, %v201_v13  }
  0x14   :  { %225 = vperm.xlu0 %268, %v222_v15  }
  0x81   :  { %v52_v17 = vpop.permute.xlu1 %51 }
  0x83   :  { %v42_v18 = vpop.permute.xlu0 %41 }
  0x85   :  { %v57_v22 = vpop.permute.xlu1 %56 }
  0x87   :  { %v47_v25 = vpop.permute.xlu0 %46 }
  0x89   :  { %v147_v37 = vpop.permute.xlu1 %146 }
  0x8b   :  { %v142_v36 = vpop.permute.xlu0 %141 }
  0x8d   :  { %v211_v47 = vpop.permute.xlu1 %210 }
  0x8f   :  { %v206_v46 = vpop.permute.xlu0 %205 }
  0x93   :  { %v226_v58 = vpop.permute.xlu0 %225 }
  0x94   :  { %v231_v60 = vrot.slane %v226_v58, %v230_v56 }
  0xdb   :  { %v254_v19 = vpop.f32.mrb[0].mxu0 }
  0xdc   :  { %v123_v20 = vadd.f32 %v254_v19, %v52_v17  ;;  %v114_v21 = vpop.f32.mrb[1].mxu0 }
  0xdd   :  { %v115_v23 = vadd.f32 %v114_v21, %v42_v18  ;;  %v255_v24 = vpop.f32.mrb[2].mxu0 }
  0xde   :  { %v126_v26 = vadd.f32 %v255_v24, %v57_v22  ;;  %v117_v27 = vpop.f32.mrb[3].mxu0  ;;  %v131_v29 = vmax.f32 %v123_v20, 0.0 }
  0xdf   :  { %v118_v28 = vadd.f32 %v117_v27, %v47_v25  ;;  %v129_v31 = vmax.f32 %v115_v23, 0.0 }
  0xe0   :  { %v132_v30 = vmax.f32 %v126_v26, 0.0 }
  0xe1   :  { %v130_v32 = vmax.f32 %v118_v28, 0.0 }
  0xe2   :  { %v136_v33 = vpack.c.bf16 %v132_v30, %v131_v29 }
  0xe3   :  { %v135_v34 = vpack.c.bf16 %v130_v32, %v129_v31 }
  0xe5   :  { %257 = vmatpush3.bf16.msra.mxu1 %v135_v34 }
  0xe6   :  { %258 = vmatprep.subr.bf16.mxu1 %v274_v16 }
  0xe9   :  { %259 = vmatpush3.bf16.msra.mxu1 %v136_v33 }
  0xec   :  { %261 = vmatmul.mubr.msk.bf16.vlgmr.msra.gmra.mrb[0].mxu1 %vm154_vm3, %v272_v35 }
 0x1bf   :  { %v192_v38 = vpop.f32.mrb[0].mxu1 }
 0x1c0   :  { %v193_v39 = vadd.f32 %v192_v38, %v142_v36  ;;  %v262_v40 = vpop.f32.mrb[1].mxu1 }
 0x1c1   :  { %v195_v41 = vpop.f32.mrb[2].mxu1 }
 0x1c2   :  { %v199_v42 = vmax.f32 %v193_v39, 0.0  ;;  %v196_v43 = vadd.f32 %v195_v41, %v147_v37  ;;  %v263_v44 = vpop.f32.mrb[3].mxu1 }
 0x1c4   :  { %v200_v45 = vmax.f32 %v196_v43, 0.0  ;;  %v213_v48 = vmul.f32 %v206_v46, %v199_v42 }
 0x1c6   :  { %v214_v49 = vmul.f32 %v211_v47, %v200_v45 }
 0x1c8   :  { %v215_v51 = vadd.f32 %v214_v49, %v213_v48 }
 0x1ca   :  { %v216_v52 = vrot.slane %v215_v51, 4 }
 0x1cc   :  { %v217_v54 = vadd.f32 %v216_v52, %v215_v51 }
 0x1ce   :  { %v218_v55 = vrot.slane %v217_v54, 2 }
 0x1d0   :  { %v219_v57 = vadd.f32 %v218_v55, %v217_v54 }
 0x1d2   :  { %v220_v59 = vrot.slane %v219_v57, 1 }
 0x1d4   :  { %v221_v61 = vadd.f32 %v220_v59, %v219_v57 }
 0x1d6   :  { %v232_v62 = vadd.f32 %v231_v60, %v221_v61 }
 0x1d8   :  { %233 = vst [vmem:[%s367_s7] sm:$0x1] %v232_v62 }

</bundles_post_ra>
